<compile_context>
chip_gen: v5e
topology: v5e:2x2
jax: 0.10.0
libtpu: 0.0.40
codegen_flags: <defaults>
</compile_context>

<pallas_src>
import jax
import jax.numpy as jnp
from jax.experimental import pallas as pl
from jax.experimental.pallas import tpu as pltpu

# Segway physical constants (Module.__init__)
C1, C2, C3, C4, C5 = 1.8, 11.5, 10.9, 68.4, 1.2
D1, D2, D3, D4, D5 = 9.3, 58.8, 38.6, 234.5, 208.3
B_CONST = 24.7


def _round_up(a, b):
    return ((a + b - 1) // b) * b


def _segway_dynamics(y, x_dot, y_dot, u):
    """Shared elementwise math.  y/x_dot/y_dot are (1, TB); u is (1, TB) or scalar."""
    cy = jnp.cos(y)
    sy = jnp.sin(y)
    # |cos| <= 1 so both denominators are bounded away from zero.
    # approx=False to keep the exact-reciprocal accuracy (1e-5 tolerance).
    inv1 = pl.reciprocal(cy - B_CONST, approx=False)
    inv2 = pl.reciprocal(cy * cy - B_CONST, approx=False)
    o1 = (cy * (-C1 * u + C2 * x_dot + 9.8 * sy)
          - C3 * u + C4 * x_dot - C5 * y_dot * y_dot * sy) * inv1
    o2 = ((D1 * u - D2 * x_dot) * cy + D3 * u - D4 * x_dot
          - sy * (D5 + y_dot * y_dot * cy)) * inv2
    return o1, o2


def _segway_kernel_vec_u(x_ref, u_ref, o_ref):
    """x_ref: (3, TB) VMEM, u_ref: (1, TB) VMEM, o_ref: (3, TB) VMEM."""
    y = x_ref[0:1, :]
    x_dot = x_ref[1:2, :]
    y_dot = x_ref[2:3, :]
    u = u_ref[0:1, :]
    o1, o2 = _segway_dynamics(y, x_dot, y_dot, u)
    o_ref[0:1, :] = y_dot
    o_ref[1:2, :] = o1
    o_ref[2:3, :] = o2


def _segway_kernel_scalar_u(u_ref, x_ref, o_ref):
    """u_ref: (1,) f32 in SMEM, x_ref: (3, TB) VMEM, o_ref: (3, TB) VMEM."""
    y = x_ref[0:1, :]
    x_dot = x_ref[1:2, :]
    y_dot = x_ref[2:3, :]
    u = u_ref[0]  # scalar broadcast into the vector math
    o1, o2 = _segway_dynamics(y, x_dot, y_dot, u)
    o_ref[0:1, :] = y_dot
    o_ref[1:2, :] = o1
    o_ref[2:3, :] = o2


def segway_forward(x, u=0.0, t=0.0, *, tile_b=2048):
    """Pallas equivalent of Segway.forward.  x: (B, 3); u: scalar, (B,) or (B, 1)."""
    del t
    B = x.shape[0]
    out_dtype = x.dtype

    # Batch goes on the lane axis; tile it (multiple of 128 lanes per block).
    tb = min(tile_b, _round_up(B, 128))
    bp = _round_up(B, tb)
    grid = (bp // tb,)

    xt = jnp.transpose(x).astype(jnp.float32)           # (3, B)
    if bp != B:
        xt = jnp.pad(xt, ((0, 0), (0, bp - B)))          # pad cols are harmless (cos(0)-b != 0)

    x_spec = pl.BlockSpec((3, tb), lambda i: (0, i))
    out_spec = pl.BlockSpec((3, tb), lambda i: (0, i))
    out_shape = jax.ShapeDtypeStruct((3, bp), jnp.float32)
    cparams = pltpu.CompilerParams(dimension_semantics=("parallel",))

    u_arr = jnp.asarray(u, dtype=jnp.float32)
    if u_arr.ndim == 0:
        # Scalar control: SMEM scalar, no (B,1) HBM array / DMA / padded VMEM row.
        cost = pl.CostEstimate(flops=30 * bp, transcendentals=2 * bp,
                               bytes_accessed=6 * bp * 4 + 4)
        out_t = pl.pallas_call(
            _segway_kernel_scalar_u,
            out_shape=out_shape,
            grid=grid,
            in_specs=[
                pl.BlockSpec(memory_space=pltpu.MemorySpace.SMEM),
                x_spec,
            ],
            out_specs=out_spec,
            compiler_params=cparams,
            cost_estimate=cost,
        )(u_arr.reshape(1), xt)
    else:
        # Per-sample control: single lane-dense (1, B) row.
        ut = jnp.broadcast_to(u_arr.reshape(-1), (B,)).astype(jnp.float32).reshape(1, B)
        if bp != B:
            ut = jnp.pad(ut, ((0, 0), (0, bp - B)))
        u_spec = pl.BlockSpec((1, tb), lambda i: (0, i))
        cost = pl.CostEstimate(flops=30 * bp, transcendentals=2 * bp,
                               bytes_accessed=7 * bp * 4)
        out_t = pl.pallas_call(
            _segway_kernel_vec_u,
            out_shape=out_shape,
            grid=grid,
            in_specs=[x_spec, u_spec],
            out_specs=out_spec,
            compiler_params=cparams,
            cost_estimate=cost,
        )(xt, ut)

    return jnp.transpose(out_t[:, :B]).astype(out_dtype)


def _segway_reference(x, u=0.0):
    """Pure-JAX reference mirroring the PyTorch forward."""
    y = x[:, 0:1]
    x_dot = x[:, 1:2]
    y_dot = x[:, 2:3]
    u = jnp.broadcast_to(jnp.asarray(u, dtype=x.dtype), y.shape)
    cy = jnp.cos(y)
    sy = jnp.sin(y)
    o1 = (cy * (-C1 * u + C2 * x_dot + 9.8 * sy)
          - C3 * u + C4 * x_dot - C5 * y_dot * y_dot * sy) / (cy - B_CONST)
    o2 = ((D1 * u - D2 * x_dot) * cy + D3 * u - D4 * x_dot
          - sy * (D5 + y_dot * y_dot * cy)) / (cy * cy - B_CONST)
    return jnp.concatenate([y_dot, o1, o2], axis=1)


if __name__ == "__main__":
    key = jax.random.PRNGKey(0)
    kx, ku, kx2 = jax.random.split(key, 3)

    # Small batch (module implies (B, 3) state, (B, 1) control).
    batch = 8
    x = jax.random.normal(kx, (batch, 3), dtype=jnp.float32)
    u = jax.random.normal(ku, (batch, 1), dtype=jnp.float32)

    # default control (u = 0.0, PyTorch default arg) -> SMEM scalar path
    out_zero = jax.block_until_ready(segway_forward(x))
    # nontrivial per-sample control -> lane-dense vector-u path
    out_u = jax.block_until_ready(segway_forward(x, u))

    ref_zero = _segway_reference(x, 0.0)
    ref_u = _segway_reference(x, u)

    assert out_zero.shape == (batch, 3)
    assert out_u.shape == (batch, 3)
    assert jnp.allclose(out_zero, ref_zero, atol=1e-5, rtol=1e-5)
    assert jnp.allclose(out_u, ref_u, atol=1e-5, rtol=1e-5)

    # Exercise the multi-block (tiled / padded) grid path with a non-multiple batch.
    batch2 = 300
    x2 = jax.random.normal(kx2, (batch2, 3), dtype=jnp.float32)
    out2 = jax.block_until_ready(segway_forward(x2, 0.5, tile_b=128))
    ref2 = _segway_reference(x2, 0.5)
    assert out2.shape == (batch2, 3)
    assert jnp.allclose(out2, ref2, atol=1e-5, rtol=1e-5)

    print("KERNEL_OK")
</pallas_src>

<mosaic_0001>
module attributes {stable_mosaic.version = 11 : i64} {
  func.func @_segway_kernel_scalar_u(%arg0: i32, %arg1: memref<1xf32, #tpu.memory_space<smem>>, %arg2: memref<3x128xf32, #tpu.memory_space<vmem>>, %arg3: memref<3x128xf32, #tpu.memory_space<vmem>>) attributes {dimension_semantics = [#tpu.dimension_semantics<parallel>], iteration_bounds = array<i64: 1>, scalar_prefetch = 0 : i64, scratch_operands = 0 : i64, tpu.core_type = #tpu.core_type<tc>, window_params = [{transform_indices = @transform_0, window_bounds = array<i64: 1>}, {transform_indices = @transform_1, window_bounds = array<i64: 3, 128>}, {transform_indices = @transform_2, window_bounds = array<i64: 3, 128>}]} {
    %c0 = arith.constant 0 : index
    %c0_0 = arith.constant 0 : index
    %0 = vector.load %arg2[%c0, %c0_0] : memref<3x128xf32, #tpu.memory_space<vmem>>, vector<1x128xf32>
    %c1 = arith.constant 1 : index
    %c0_1 = arith.constant 0 : index
    %1 = vector.load %arg2[%c1, %c0_1] : memref<3x128xf32, #tpu.memory_space<vmem>>, vector<1x128xf32>
    %c2 = arith.constant 2 : index
    %c0_2 = arith.constant 0 : index
    %2 = vector.load %arg2[%c2, %c0_2] : memref<3x128xf32, #tpu.memory_space<vmem>>, vector<1x128xf32>
    %c0_3 = arith.constant 0 : index
    %3 = memref.load %arg1[%c0_3] : memref<1xf32, #tpu.memory_space<smem>>
    %4 = math.cos %0 : vector<1x128xf32>
    %5 = math.sin %0 : vector<1x128xf32>
    %cst = arith.constant 2.470000e+01 : f32
    %6 = vector.broadcast %cst : f32 to vector<1x128xf32>
    %7 = arith.subf %4, %6 : vector<1x128xf32>
    %8 = tpu.reciprocal %7 : vector<1x128xf32> -> vector<1x128xf32>
    %9 = arith.mulf %4, %4 : vector<1x128xf32>
    %cst_4 = arith.constant 2.470000e+01 : f32
    %10 = vector.broadcast %cst_4 : f32 to vector<1x128xf32>
    %11 = arith.subf %9, %10 : vector<1x128xf32>
    %12 = tpu.reciprocal %11 : vector<1x128xf32> -> vector<1x128xf32>
    %cst_5 = arith.constant -1.800000e+00 : f32
    %13 = arith.mulf %cst_5, %3 : f32
    %cst_6 = arith.constant 1.150000e+01 : f32
    %14 = vector.broadcast %cst_6 : f32 to vector<1x128xf32>
    %15 = arith.mulf %14, %1 : vector<1x128xf32>
    %16 = vector.broadcast %13 : f32 to vector<1x128xf32>
    %17 = arith.addf %16, %15 : vector<1x128xf32>
    %cst_7 = arith.constant 9.800000e+00 : f32
    %18 = vector.broadcast %cst_7 : f32 to vector<1x128xf32>
    %19 = arith.mulf %18, %5 : vector<1x128xf32>
    %20 = arith.addf %17, %19 : vector<1x128xf32>
    %21 = arith.mulf %4, %20 : vector<1x128xf32>
    %cst_8 = arith.constant 1.090000e+01 : f32
    %22 = arith.mulf %cst_8, %3 : f32
    %23 = vector.broadcast %22 : f32 to vector<1x128xf32>
    %24 = arith.subf %21, %23 : vector<1x128xf32>
    %cst_9 = arith.constant 6.840000e+01 : f32
    %25 = vector.broadcast %cst_9 : f32 to vector<1x128xf32>
    %26 = arith.mulf %25, %1 : vector<1x128xf32>
    %27 = arith.addf %24, %26 : vector<1x128xf32>
    %cst_10 = arith.constant 1.200000e+00 : f32
    %28 = vector.broadcast %cst_10 : f32 to vector<1x128xf32>
    %29 = arith.mulf %28, %2 : vector<1x128xf32>
    %30 = arith.mulf %29, %2 : vector<1x128xf32>
    %31 = arith.mulf %30, %5 : vector<1x128xf32>
    %32 = arith.subf %27, %31 : vector<1x128xf32>
    %33 = arith.mulf %32, %8 : vector<1x128xf32>
    %cst_11 = arith.constant 9.300000e+00 : f32
    %34 = arith.mulf %cst_11, %3 : f32
    %cst_12 = arith.constant 5.880000e+01 : f32
    %35 = vector.broadcast %cst_12 : f32 to vector<1x128xf32>
    %36 = arith.mulf %35, %1 : vector<1x128xf32>
    %37 = vector.broadcast %34 : f32 to vector<1x128xf32>
    %38 = arith.subf %37, %36 : vector<1x128xf32>
    %39 = arith.mulf %38, %4 : vector<1x128xf32>
    %cst_13 = arith.constant 3.860000e+01 : f32
    %40 = arith.mulf %cst_13, %3 : f32
    %41 = vector.broadcast %40 : f32 to vector<1x128xf32>
    %42 = arith.addf %39, %41 : vector<1x128xf32>
    %cst_14 = arith.constant 2.345000e+02 : f32
    %43 = vector.broadcast %cst_14 : f32 to vector<1x128xf32>
    %44 = arith.mulf %43, %1 : vector<1x128xf32>
    %45 = arith.subf %42, %44 : vector<1x128xf32>
    %46 = arith.mulf %2, %2 : vector<1x128xf32>
    %47 = arith.mulf %46, %4 : vector<1x128xf32>
    %cst_15 = arith.constant 2.083000e+02 : f32
    %48 = vector.broadcast %cst_15 : f32 to vector<1x128xf32>
    %49 = arith.addf %48, %47 : vector<1x128xf32>
    %50 = arith.mulf %5, %49 : vector<1x128xf32>
    %51 = arith.subf %45, %50 : vector<1x128xf32>
    %52 = arith.mulf %51, %12 : vector<1x128xf32>
    %c0_16 = arith.constant 0 : index
    %c0_17 = arith.constant 0 : index
    %53 = vector.load %arg3[%c0_16, %c0_17] : memref<3x128xf32, #tpu.memory_space<vmem>>, vector<1x128xf32>
    tpu.vector_store %arg3[%c0_16, %c0_17], %2 {strides = array<i32>} : memref<3x128xf32, #tpu.memory_space<vmem>>, vector<1x128xf32>,
    %c1_18 = arith.constant 1 : index
    %c0_19 = arith.constant 0 : index
    %54 = vector.load %arg3[%c1_18, %c0_19] : memref<3x128xf32, #tpu.memory_space<vmem>>, vector<1x128xf32>
    tpu.vector_store %arg3[%c1_18, %c0_19], %33 {strides = array<i32>} : memref<3x128xf32, #tpu.memory_space<vmem>>, vector<1x128xf32>,
    %c2_20 = arith.constant 2 : index
    %c0_21 = arith.constant 0 : index
    %55 = vector.load %arg3[%c2_20, %c0_21] : memref<3x128xf32, #tpu.memory_space<vmem>>, vector<1x128xf32>
    tpu.vector_store %arg3[%c2_20, %c0_21], %52 {strides = array<i32>} : memref<3x128xf32, #tpu.memory_space<vmem>>, vector<1x128xf32>,
    return
  }
  func.func @transform_0(%arg0: i32) -> i32 {
    %c0_i32 = arith.constant 0 : i32
    %c0_i32_0 = arith.constant 0 : i32
    return %c0_i32 : i32
  }
  func.func @transform_1(%arg0: i32) -> (i32, i32) {
    %c0_i32 = arith.constant 0 : i32
    %c0_i32_0 = arith.constant 0 : i32
    return %c0_i32, %arg0 : i32, i32
  }
  func.func @transform_2(%arg0: i32) -> (i32, i32) {
    %c0_i32 = arith.constant 0 : i32
    %c0_i32_0 = arith.constant 0 : i32
    return %c0_i32, %arg0 : i32, i32
  }
}

</mosaic_0001>

<bundles_post_ra>
// kernel: tpu_custom_call.1
= control target key start
LH: loop header
LB: loop body
LE: loop exit
PB: predicated region body
PF: predicated region fallthrough
CT: control target
= control target key end

     0   :  { %8 = vsyncpa [#allocation4], 0  ;;  %s593_s0 = inlined_call_operand.<no memory space> [shape: f32[1], index: 0, kind: input, shape index: {}]   ;;  %s594_s1 = inlined_call_operand.hbm [shape: f32[3,128], index: 1, kind: input, shape index: {}]   ;;  %s595_s2 = inlined_call_operand.hbm [shape: f32[3,128], index: 2, kind: output, shape index: {}]  }
   0x1   :  { %9 = vsyncpa [#allocation5], 0  ;;  %s17_s11 = sshll.u32 %s594_s1, 4  ;;  %s497_s12 = smov [#allocation3]   ;;  %s18_s11 = int_to_ptr.hbm [resolvable:$true] %s17_s11 }
   0x2   :  { %s19_s13 = sshll.u32 %s497_s12, 4  ;;  %s20_s13 = int_to_ptr.vmem [resolvable:$true] %s19_s13 }
   0x3   :  { %22 = dma.hbm_to_vmem [thread:$0]  %s18_s11, 64, %s20_s13, [#allocation4]  }
   0x4   :  { %493 = dma.done.wait [#allocation4], 64  }
   0x5   :  { %494 = vsyncadd [#allocation4], 4294967232  ;;  %v524_v0 = vld [vmem:[#allocation3 + $0x2] sm:$0x1]  ;;  %v526_v1 = vld [vmem:[#allocation3] sm:$0x1] }
   0x6   :  { %404 = vst [vmem:[#allocation6] sm:$0x1] %v524_v0  ;;  %v34_v2 = vand.u32 2139095040, %v526_v1  ;;  %v31_v4 = vand.u32 2147483647, %v526_v1  ;;  %vm33_vm12 = vcmp.lt.s32.totalorder %v526_v1, 0 }
   0x7   :  { %v498_v13 = vmov 683565275   ;;  %v499_v15 = vmov 2475754826   ;;  %v500_v17 = vmov 2131351028  }
   0x8   :  { %v35_v3 = vshrl.u32 %v34_v2, 23  ;;  %v38_v7 = vand.u32 8388607, %v31_v4  ;;  %v501_v19 = vmov 2102212464   ;;  %s414_s28 = sshll.u32 %s595_s2, 4  ;;  %s415_s28 = int_to_ptr.hbm [resolvable:$true] %s414_s28 }
   0x9   :  { %v502_v21 = vmov 920167782   ;;  %v503_v27 = vmov 1326507024   ;;  %vm32_vm13 = vcmp.le.f32.partialorder %v31_v4, 0.7853982 }
   0xa   :  { %v424_v5 = vadd.s32 4294967169, %v35_v3  ;;  %v39_v10 = vor.u32 8388608, %v38_v7  ;;  %v504_v3 = vmov 0   ;;  %s371_s15 = smul.f32 -1.8, %s593_s0 }
   0xb   :  { %s388_s18 = smul.f32 9.3, %s593_s0 }
   0xc   :  { %v41_v6 = vadd.s32 1, %v424_v5  ;;  %v536_v29 = vshll.u32 %v39_v10, 8  ;;  %s378_s21 = smul.f32 10.9, %s593_s0 }
   0xd   :  { %s393_s24 = smul.f32 38.6, %s593_s0  ;;  %s505_s0 = smov [#allocation6]  }
   0xe   :  { %vm42_vm0 = vcmp.gt.s32.totalorder %v41_v6, 0  ;;  %v80_v41 = vand.u32 65535, %v536_v29  ;;  %v81_v42 = vshrl.u32 %v536_v29, 16  ;;  %s412_s25 = sshll.u32 %s505_s0, 4  ;;  %s413_s25 = int_to_ptr.vmem [resolvable:$true] %s412_s25 }
   0xf   :  { %v43_v8 = vsel %vm42_vm0, %v41_v6, 0 }
  0x10   :  { %v45_v9 = vand.u32 31, %v43_v8  ;;  %v533_v11 = vshrl.u32 %v43_v8, 5 }
  0x12   :  { %v46_v12 = vsub.s32 32, %v45_v9  ;;  %v48_v14 = vshll.u32 %v498_v13, %v45_v9  ;;  %v51_v16 = vshll.u32 %v499_v15, %v45_v9  ;;  %v54_v18 = vshll.u32 %v500_v17, %v45_v9 }
  0x13   :  { %v57_v20 = vshll.u32 %v501_v19, %v45_v9  ;;  %v60_v22 = vshll.u32 %v502_v21, %v45_v9  ;;  %vm63_vm1 = vcmp.lt.s32.totalorder %v533_v11, 1  ;;  %vm66_vm2 = vcmp.lt.s32.totalorder %v533_v11, 4 }
  0x14   :  { %v49_v23 = vshrl.u32 %v499_v15, %v46_v12  ;;  %v52_v24 = vshrl.u32 %v500_v17, %v46_v12  ;;  %v55_v25 = vshrl.u32 %v501_v19, %v46_v12  ;;  %v58_v26 = vshrl.u32 %v502_v21, %v46_v12 }
  0x15   :  { %v61_v28 = vshrl.u32 %v503_v27, %v46_v12  ;;  %vm65_vm3 = vcmp.lt.s32.totalorder %v533_v11, 3  ;;  %vm64_vm4 = vcmp.lt.s32.totalorder %v533_v11, 2  ;;  %v47_v49 = vshrl.u32 %v498_v13, %v46_v12 }
  0x16   :  { %v50_v30 = vor.u32 %v49_v23, %v48_v14  ;;  %v53_v31 = vor.u32 %v52_v24, %v51_v16  ;;  %v56_v32 = vor.u32 %v55_v25, %v54_v18  ;;  %v59_v33 = vor.u32 %v58_v26, %v57_v20 }
  0x17   :  { %v62_v34 = vor.u32 %v61_v28, %v60_v22 }
  0x18   :  { %v71_v35 = vsel %vm63_vm1, %v50_v30, %v53_v31  ;;  %v75_v36 = vsel %vm63_vm1, %v53_v31, %v56_v32  ;;  %v72_v37 = vsel %vm66_vm2, %v59_v33, 920167782  ;;  %v67_v62 = vsel %vm63_vm1, %v47_v49, %v50_v30 }
  0x19   :  { %v76_v38 = vsel %vm66_vm2, %v62_v34, 1326507024  ;;  %v73_v39 = vsel %vm65_vm3, %v56_v32, %v72_v37  ;;  %v68_v2 = vsel %vm66_vm2, %v56_v32, 2102212464 }
  0x1a   :  { %v77_v40 = vsel %vm65_vm3, %v59_v33, %v76_v38  ;;  %v74_v43 = vsel %vm64_vm4, %v71_v35, %v73_v39  ;;  %v69_v14 = vsel %vm65_vm3, %v53_v31, %v68_v2 }
  0x1b   :  { %v78_v44 = vsel %vm64_vm4, %v75_v36, %v77_v40  ;;  %v104_v47 = vand.u32 65535, %v74_v43  ;;  %v105_v48 = vshrl.u32 %v74_v43, 16  ;;  %v70_v22 = vsel %vm64_vm4, %v67_v62, %v69_v14 }
  0x1c   :  { %v82_v45 = vand.u32 65535, %v78_v44  ;;  %v83_v46 = vshrl.u32 %v78_v44, 16  ;;  %v124_v26 = vmul.u32 %v536_v29, %v70_v22  ;;  %vm174_vm4 = vweird.f32 %v526_v1 }
  0x1d   :  { %v106_v53 = vmul.u32 %v104_v47, %v80_v41  ;;  %v107_v54 = vmul.u32 %v105_v48, %v80_v41  ;;  %v108_v55 = vmul.u32 %v104_v47, %v81_v42  ;;  %v109_v59 = vmul.u32 %v105_v48, %v81_v42 }
  0x1e   :  { %v84_v50 = vmul.u32 %v82_v45, %v80_v41  ;;  %v85_v51 = vmul.u32 %v83_v46, %v80_v41  ;;  %v86_v52 = vmul.u32 %v82_v45, %v81_v42  ;;  %v87_v56 = vmul.u32 %v83_v46, %v81_v42 }
  0x1f   :  { %v110_v60 = vshll.u32 %v107_v54, 16  ;;  %v112_v61 = vshll.u32 %v108_v55, 16  ;;  %v111_v12 = vshrl.u32 %v107_v54, 16  ;;  %v113_v18 = vshrl.u32 %v108_v55, 16 }
  0x20   :  { %v88_v57 = vshll.u32 %v85_v51, 16  ;;  %v90_v58 = vshll.u32 %v86_v52, 16  ;;  %v89_v7 = vshrl.u32 %v85_v51, 16  ;;  %v91_v15 = vshrl.u32 %v86_v52, 16 }
  0x21   :  { %vm114_vm6 = vc.u32 %v106_v53, %v110_v60  ;;  %v116_v6 = vadd.s32 %v110_v60, %v106_v53 }
  0x22   :  { %vm92_vm5 = vc.u32 %v84_v50, %v88_v57  ;;  %v94_v63 = vadd.s32 %v88_v57, %v84_v50  ;;  %v115_v9 = vsel %vm114_vm6, 1, %v504_v3 }
  0x23   :  { %v93_v5 = vsel %vm92_vm5, 1, %v504_v3  ;;  %v117_v13 = vadd.s32 %v115_v9, %v109_v59  ;;  %vm118_vm8 = vc.u32 %v116_v6, %v112_v61  ;;  %v120_v21 = vadd.s32 %v116_v6, %v112_v61 }
  0x24   :  { %v95_v8 = vadd.s32 %v93_v5, %v87_v56  ;;  %vm96_vm7 = vc.u32 %v94_v63, %v90_v58  ;;  %v119_v17 = vsel %vm118_vm8, 1, %v504_v3 }
  0x25   :  { %v97_v10 = vsel %vm96_vm7, 1, %v504_v3  ;;  %v121_v19 = vadd.s32 %v119_v17, %v117_v13 }
  0x26   :  { %v99_v16 = vadd.s32 %v97_v10, %v95_v8  ;;  %v28_v10 = vld [vmem:[#allocation3 + $0x1] sm:$0x1] }
  0x27   :  { %v122_v23 = vadd.s32 %v121_v19, %v111_v12  ;;  %v372_v17 = vmul.f32 11.5, %v28_v10 }
  0x28   :  { %v100_v20 = vadd.s32 %v99_v16, %v89_v7 }
  0x29   :  { %v123_v25 = vadd.s32 %v122_v23, %v113_v18  ;;  %v373_v18 = vstv %s371_s15  ;;  %v389_v23 = vmul.f32 58.8, %v28_v10 }
  0x2a   :  { %v101_v24 = vadd.s32 %v100_v20, %v91_v15 }
  0x2b   :  { %v127_v27 = vadd.s32 1, %v123_v25 }
  0x2c   :  { %vm126_vm9 = vc.u32 %v101_v24, %v120_v21  ;;  %v125_v11 = vadd.s32 %v120_v21, %v101_v24 }
  0x2d   :  { %v128_v28 = vsel %vm126_vm9, %v127_v27, %v123_v25  ;;  %v390_v27 = vstv %s388_s18 }
  0x2e   :  { %v129_v30 = vadd.s32 %v128_v28, %v124_v26  ;;  %v374_v26 = vadd.f32 %v373_v18, %v372_v17 }
  0x30   :  { %v130_v31 = vadd.s32 536870912, %v129_v30 }
  0x32   :  { %v131_v32 = vshrl.u32 %v130_v31, 30 }
  0x34   :  { %v132_v33 = vshll.u32 %v131_v32, 30  ;;  %v155_v51 = vsub.s32 4, %v131_v32 }
  0x36   :  { %v133_v34 = vsub.s32 %v129_v30, %v132_v33  ;;  %v156_v55 = vsel %vm33_vm12, %v155_v51, %v131_v32  ;;  %v383_v32 = vmul.f32 1.2, %v524_v0  ;;  %v391_v33 = vsub.f32 %v390_v27, %v389_v23 }
  0x37   :  { %v158_v58 = vsel %vm32_vm13, 0, %v156_v55 }
  0x38   :  { %vm134_vm10 = vcmp.lt.s32.totalorder %v133_v34, 0  ;;  %v135_v35 = vsub.s32 0, %v133_v34  ;;  %v329_v61 = vadd.s32 3, %v158_v58  ;;  %v175_v5 = vand.u32 3, %v158_v58 }
  0x3a   :  { %v136_v36 = vsel %vm134_vm10, %v135_v35, %v133_v34  ;;  %v330_v6 = vand.u32 3, %v329_v61  ;;  %vm180_vm14 = vcmp.eq.s32.totalorder %v175_v5, 2  ;;  %vm176_vm0 = vcmp.lt.s32.totalorder %v175_v5, 2 }
  0x3b   :  { %v137_v37 = vclz %v136_v36  ;;  %vm177_vm1 = vcmp.eq.s32.totalorder %v175_v5, 0  ;;  %v379_v36 = vstv %s378_s21 }
  0x3c   :  { %vm335_vm15 = vcmp.eq.s32.totalorder %v330_v6, 2  ;;  %vm331_vm2 = vcmp.lt.s32.totalorder %v330_v6, 2  ;;  %vm332_vm3 = vcmp.eq.s32.totalorder %v330_v6, 0 }
  0x3d   :  { %v425_v38 = vadd.s32 4294967294, %v137_v37 }
  0x3f   :  { %vm426_vm11 = vcmp.lt.s32.totalorder %v425_v38, 0 }
  0x40   :  { %v140_v39 = vsel %vm426_vm11, 0, %v425_v38  ;;  %v384_v38 = vmul.f32 %v383_v32, %v524_v0 }
  0x41   :  { %v141_v40 = vsub.s32 32, %v140_v39  ;;  %v142_v41 = vshll.u32 %v133_v34, %v140_v39  ;;  %v145_v42 = vsub.s32 4294967266, %v140_v39 }
  0x43   :  { %v143_v29 = vshrl.u32 %v125_v11, %v141_v40  ;;  %v146_v43 = vadd.s32 127, %v145_v42  ;;  %v394_v42 = vstv %s393_s24 }
  0x45   :  { %v144_v44 = vor.u32 %v143_v29, %v142_v41  ;;  %v147_v45 = vshll.u32 %v146_v43, 23  ;;  %v381_v41 = vmul.f32 68.4, %v28_v10 }
  0x47   :  { %v148_v46 = vor.u32 4788187, %v147_v45  ;;  %v151_v47 = vcvt.s32.f32 %v144_v44  ;;  %v396_v45 = vmul.f32 234.5, %v28_v10 }
  0x49   :  { %v149_v48 = vand.u32 2147483647, %v148_v46 }
  0x4b   :  { %v152_v49 = vmul.f32 %v151_v47, %v149_v48 }
  0x4d   :  { %v153_v50 = vxor.u32 2147483648, %v152_v49 }
  0x4f   :  { %v154_v52 = vsel %vm33_vm12, %v153_v50, %v152_v49 }
  0x50   :  { %v157_v53 = vsel %vm32_vm13, %v526_v1, %v154_v52  ;;  %v398_v1 = vmul.f32 %v524_v0, %v524_v0 }
  0x51   :  { %v159_v54 = vmul.f32 %v157_v53, %v157_v53 }
  0x53   :  { %v160_v56 = vmul.f32 -0.001358992, %v159_v54  ;;  %v167_v57 = vmul.f32 -0.00019511016, %v159_v54 }
  0x55   :  { %v161_v59 = vadd.f32 0.041655596, %v160_v56  ;;  %v168_v60 = vadd.f32 0.008332121, %v167_v57 }
  0x57   :  { %v162_v62 = vmul.f32 %v161_v59, %v159_v54  ;;  %v169_v63 = vmul.f32 %v168_v60, %v159_v54 }
  0x59   :  { %v163_v2 = vadd.f32 -0.4999988, %v162_v62  ;;  %v170_v3 = vadd.f32 -0.16666654, %v169_v63 }
  0x5b   :  { %v164_v4 = vmul.f32 %v163_v2, %v159_v54  ;;  %v171_v7 = vmul.f32 %v170_v3, %v159_v54 }
  0x5d   :  { %v165_v8 = vadd.f32 1.0, %v164_v4  ;;  %v172_v9 = vadd.f32 1.0, %v171_v7 }
  0x5f   :  { %v173_v12 = vmul.f32 %v172_v9, %v157_v53  ;;  %v181_v13 = vxor.u32 2147483648, %v165_v8 }
  0x61   :  { %v178_v14 = vxor.u32 2147483648, %v173_v12  ;;  %v182_v15 = vsel %vm180_vm14, %v181_v13, %v173_v12  ;;  %v337_v16 = vsel %vm335_vm15, %v181_v13, %v173_v12 }
  0x63   :  { %v179_v19 = vsel %vm177_vm1, %v165_v8, %v178_v14  ;;  %v334_v20 = vsel %vm332_vm3, %v165_v8, %v178_v14 }
  0x64   :  { %v183_v21 = vsel %vm176_vm0, %v179_v19, %v182_v15  ;;  %v338_v22 = vsel %vm331_vm2, %v334_v20, %v337_v16 }
  0x65   :  { %v184_v24 = vsel %vm174_vm4, nan, %v183_v21  ;;  %v339_v25 = vsel %vm174_vm4, nan, %v338_v22 }
  0x66   :  { %v430_v28 = vadd.f32 -24.7, %v184_v24  ;;  %v355_v30 = vmul.f32 %v184_v24, %v184_v24  ;;  %v375_v31 = vmul.f32 9.8, %v339_v25  ;;  %v392_v11 = vmul.f32 %v391_v33, %v184_v24 }
  0x67   :  { %v399_v39 = vmul.f32 %v398_v1, %v184_v24  ;;  %v385_v46 = vmul.f32 %v384_v38, %v339_v25 }
  0x68   :  { %441 = vrcp.f32 %v430_v28  ;;  %v431_v34 = vadd.f32 -24.7, %v355_v30  ;;  %v376_v35 = vadd.f32 %v375_v31, %v374_v26  ;;  %v352_v43 = vand.u32 2147483648, %v430_v28 }
  0x69   :  { %vm346_vm5 = vweird.f32 %v430_v28  ;;  %v395_v47 = vadd.f32 %v394_v42, %v392_v11  ;;  %v400_v48 = vadd.f32 208.3, %v399_v39  ;;  %v350_v51 = vand.u32 2147483647, %v430_v28 }
  0x6a   :  { %443 = vrcp.f32 %v431_v34  ;;  %v377_v37 = vmul.f32 %v376_v35, %v184_v24  ;;  %v353_v53 = vor.u32 1.1754944e-38, %v352_v43  ;;  %vm362_vm7 = vweird.f32 %v431_v34 }
  0x6b   :  { %v366_v55 = vand.u32 2147483647, %v431_v34  ;;  %v368_v56 = vand.u32 2147483648, %v431_v34  ;;  %v397_v58 = vsub.f32 %v395_v47, %v396_v45  ;;  %v401_v59 = vmul.f32 %v400_v48, %v339_v25 }
  0x6c   :  { %v380_v40 = vsub.f32 %v377_v37, %v379_v36  ;;  %vm351_vm10 = vcmp.eq.f32.partialorder %v350_v51, 8.507059e+37 }
  0x6d   :  { %v369_v2 = vor.u32 1.1754944e-38, %v368_v56  ;;  %vm367_vm12 = vcmp.eq.f32.partialorder %v366_v55, 8.507059e+37  ;;  %v402_v6 = vsub.f32 %v397_v58, %v401_v59 }
  0x6e   :  { %v442_v29 = vpop.eup %441  ;;  %v382_v52 = vadd.f32 %v381_v41, %v380_v40 }
  0x6f   :  { %v342_v44 = vmul.f32 %v442_v29, %v430_v28  ;;  %vm347_vm6 = vweird.f32 %v442_v29 }
  0x70   :  { %v444_v49 = vpop.eup %443  ;;  %vm348_vm8 = vmor %vm346_vm5, %vm347_vm6  ;;  %v386_v61 = vsub.f32 %v382_v52, %v385_v46 }
  0x71   :  { %v343_v50 = vsub.f32 1.0, %v342_v44  ;;  %v358_v0 = vmul.f32 %v444_v49, %v431_v34  ;;  %vm363_vm9 = vweird.f32 %v444_v49 }
  0x72   :  { %vm364_vm11 = vmor %vm362_vm7, %vm363_vm9 }
  0x73   :  { %v344_v54 = vmul.f32 %v442_v29, %v343_v50  ;;  %v359_v57 = vsub.f32 1.0, %v358_v0 }
  0x75   :  { %v345_v60 = vadd.f32 %v442_v29, %v344_v54  ;;  %v360_v62 = vmul.f32 %v444_v49, %v359_v57 }
  0x77   :  { %v349_v63 = vsel %vm348_vm8, %v442_v29, %v345_v60  ;;  %v361_v5 = vadd.f32 %v444_v49, %v360_v62 }
  0x78   :  { %v354_v3 = vsel %vm351_vm10, %v353_v53, %v349_v63 }
  0x79   :  { %v387_v4 = vmul.f32 %v386_v61, %v354_v3  ;;  %v365_v7 = vsel %vm364_vm11, %v444_v49, %v361_v5 }
  0x7a   :  { %v370_v8 = vsel %vm367_vm12, %v369_v2, %v365_v7 }
  0x7b   :  { %405 = vst [vmem:[#allocation6 + $0x1] sm:$0x1] %v387_v4  ;;  %v403_v9 = vmul.f32 %v402_v6, %v370_v8 }
  0x7d   :  { %406 = vst [vmem:[#allocation6 + $0x2] sm:$0x1] %v403_v9 }
  0x7e   :  { %417 = dma.vmem_to_hbm [thread:$0]  %s413_s25, 64, %s415_s28, [#allocation5]  }
  0x7f   :  { %495 = dma.done.wait [#allocation5], 64  }
  0x80   :  { %496 = vsyncadd [#allocation5], 4294967232 }
  0x81   :  { %422 = vsyncpa [#allocation4], 1 }
  0x82   :  { %423 = vsyncpa [#allocation5], 1 }

</bundles_post_ra>
